<compile_context>
chip_gen: v7x
topology: tpu7x:2x2x1
jax: 0.10.0
libtpu: 0.0.40
codegen_flags: <defaults>
</compile_context>

<pallas_src>
import functools

import jax
import jax.numpy as jnp
from jax.experimental import pallas as pl
from jax.experimental.pallas import tpu as pltpu


def _proxy_anchor_kernel(x_ref, t_ref, pT_ref, out_ref,
                         pn_ref, pos_acc, neg_acc, cnt_acc,
                         *, mrg, alpha, nb_classes):
    step = pl.program_id(0)

    # One-time init: l2-normalize proxies into scratch, zero the accumulators.
    @pl.when(step == 0)
    def _init():
        p = pT_ref[...].astype(jnp.float32)                        # (D, C)
        pn_ref[...] = p * jax.lax.rsqrt(
            jnp.sum(p * p, axis=0, keepdims=True) + 1e-12)
        pos_acc[...] = jnp.zeros_like(pos_acc)
        neg_acc[...] = jnp.zeros_like(neg_acc)
        cnt_acc[...] = jnp.zeros_like(cnt_acc)

    # Per-tile work.
    x = x_ref[...].astype(jnp.float32)                             # (TB, D)
    xn = x * jax.lax.rsqrt(jnp.sum(x * x, axis=1, keepdims=True) + 1e-12)

    # Cosine similarity, MXU-native (TB, D) @ (D, C) -> (TB, C).
    cos = jnp.dot(xn, pn_ref[...], preferred_element_type=jnp.float32)

    labels = t_ref[...]                                            # (TB, 1) int32
    tb, c = cos.shape
    class_ids = jax.lax.broadcasted_iota(jnp.int32, (tb, c), 1)
    one_hot = (class_ids == labels).astype(jnp.float32)            # (TB, C)
    valid = (labels >= 0).astype(jnp.float32)                      # (TB, 1); 0 for pad rows
    neg_mask = valid - one_hot                                     # (TB, C)

    pos_acc[...] += jnp.sum(one_hot * jnp.exp(-alpha * (cos - mrg)),
                            axis=0, keepdims=True)                 # (1, C)
    neg_acc[...] += jnp.sum(neg_mask * jnp.exp(alpha * (cos + mrg)),
                            axis=0, keepdims=True)                 # (1, C)
    cnt_acc[...] += jnp.sum(one_hot, axis=0, keepdims=True)        # (1, C)

    # Epilogue on the last batch tile: log1p reductions + normalization.
    @pl.when(step == pl.num_programs(0) - 1)
    def _finalize():
        num_valid = jnp.sum((cnt_acc[...] > 0.0).astype(jnp.float32))
        pos_term = jnp.sum(jnp.log1p(pos_acc[...])) / num_valid
        neg_term = jnp.sum(jnp.log1p(neg_acc[...])) / float(nb_classes)
        out_ref[0, 0] = pos_term + neg_term


def proxy_anchor_loss(X, T, proxies, mrg=0.1, alpha=32.0, tile_b=128):
    """X: (B, D) float32 embeddings, T: (B,) int labels, proxies: (C, D)."""
    B, D = X.shape
    C = proxies.shape[0]

    # Batch tile: full batch if it already fits a single block, otherwise a
    # multiple of 8 (sublane granule). Remainder rows are padded + masked.
    tb = min(int(tile_b), B)
    if tb < B:
        tb = max(8, (tb // 8) * 8)
    num_tiles = pl.cdiv(B, tb)
    b_pad = tb * num_tiles

    labels = T.astype(jnp.int32)
    if b_pad != B:
        X = jnp.pad(X, ((0, b_pad - B), (0, 0)))
        labels = jnp.pad(labels, (0, b_pad - B), constant_values=-1)
    labels = labels.reshape(b_pad, 1)

    # Present proxies MXU-native / lane-dense as (D, C); layout plumbing only.
    proxies_t = jnp.transpose(proxies)

    kernel = functools.partial(_proxy_anchor_kernel, mrg=float(mrg),
                               alpha=float(alpha), nb_classes=C)

    out = pl.pallas_call(
        kernel,
        out_shape=jax.ShapeDtypeStruct((1, 1), jnp.float32),
        grid=(num_tiles,),
        in_specs=[
            pl.BlockSpec((tb, D), lambda i: (i, 0)),     # X batch tile
            pl.BlockSpec((tb, 1), lambda i: (i, 0)),     # labels batch tile
            pl.BlockSpec((D, C), lambda i: (0, 0)),      # proxies^T (resident)
        ],
        out_specs=pl.BlockSpec(memory_space=pltpu.MemorySpace.SMEM),
        scratch_shapes=[
            pltpu.VMEM((D, C), jnp.float32),   # normalized proxies
            pltpu.VMEM((1, C), jnp.float32),   # per-class positive exp-sum
            pltpu.VMEM((1, C), jnp.float32),   # per-class negative exp-sum
            pltpu.VMEM((1, C), jnp.float32),   # positives-per-class count
        ],
        compiler_params=pltpu.CompilerParams(
            dimension_semantics=("arbitrary",)),
    )(X, labels, proxies_t)
    return out[0, 0]


def _reference_loss(X, T, proxies, mrg=0.1, alpha=32.0):
    """Pure-JAX reference mirroring the PyTorch forward."""
    nb_classes = proxies.shape[0]

    def l2n(a):
        return a / jnp.sqrt(jnp.sum(a * a, axis=1, keepdims=True) + 1e-12)

    cos = l2n(X) @ l2n(proxies).T
    one_hot = (T[:, None] == jnp.arange(nb_classes)[None, :]).astype(jnp.float32)
    pos = jnp.sum(one_hot * jnp.exp(-alpha * (cos - mrg)), axis=0)
    neg = jnp.sum((1.0 - one_hot) * jnp.exp(alpha * (cos + mrg)), axis=0)
    num_valid = jnp.sum((jnp.sum(one_hot, axis=0) > 0).astype(jnp.float32))
    return jnp.sum(jnp.log1p(pos)) / num_valid + jnp.sum(jnp.log1p(neg)) / nb_classes


if __name__ == "__main__":
    key = jax.random.PRNGKey(0)
    batch, nb_classes, sz_embed = 16, 16, 32
    mrg, alpha = 0.1, 32.0

    kx, kp, kt = jax.random.split(key, 3)
    X = jax.random.normal(kx, (batch, sz_embed), dtype=jnp.float32)
    # deterministic kaiming_normal_(mode='fan_out') init: std = sqrt(2 / nb_classes)
    proxies = jax.random.normal(kp, (nb_classes, sz_embed), dtype=jnp.float32) * jnp.sqrt(
        2.0 / nb_classes
    )
    T = jax.random.randint(kt, (batch,), 0, nb_classes, dtype=jnp.int32)

    # tile_b=8 -> grid of 2 batch tiles, exercising the accumulator path.
    loss = proxy_anchor_loss(X, T, proxies, mrg=mrg, alpha=alpha, tile_b=8)
    loss = jax.block_until_ready(loss)

    ref = _reference_loss(X, T, proxies, mrg=mrg, alpha=alpha)
    assert jnp.allclose(loss, ref, rtol=1e-3, atol=1e-3), (loss, ref)

    print("KERNEL_OK")
</pallas_src>

<mosaic_0001>
module attributes {stable_mosaic.version = 11 : i64} {
  func.func @_proxy_anchor_kernel(%arg0: i32, %arg1: memref<8x32xf32, #tpu.memory_space<vmem>>, %arg2: memref<8x1xi32, #tpu.memory_space<vmem>>, %arg3: memref<32x16xf32, #tpu.memory_space<vmem>>, %arg4: memref<1x1xf32, #tpu.memory_space<smem>>, %arg5: memref<32x16xf32, #tpu.memory_space<vmem>>, %arg6: memref<1x16xf32, #tpu.memory_space<vmem>>, %arg7: memref<1x16xf32, #tpu.memory_space<vmem>>, %arg8: memref<1x16xf32, #tpu.memory_space<vmem>>) attributes {dimension_semantics = [#tpu.dimension_semantics<arbitrary>], iteration_bounds = array<i64: 2>, scalar_prefetch = 0 : i64, scratch_operands = 4 : i64, tpu.core_type = #tpu.core_type<tc>, window_params = [{transform_indices = @transform_0, window_bounds = array<i64: 8, 32>}, {transform_indices = @transform_1, window_bounds = array<i64: 8, 1>}, {pipeline_mode = #tpu.pipeline_mode<synchronous>, transform_indices = @transform_2, window_bounds = array<i64: 32, 16>}, {transform_indices = @transform_3, window_bounds = array<i64: 1, 1>}]} {
    %c0_i32 = arith.constant 0 : i32
    %0 = arith.cmpi eq, %arg0, %c0_i32 : i32
    %1 = arith.extui %0 : i1 to i32
    %c0_i32_0 = arith.constant 0 : i32
    %2 = arith.cmpi ne, %1, %c0_i32_0 : i32
    scf.if %2 {
      %c0_29 = arith.constant 0 : index
      %c0_30 = arith.constant 0 : index
      %56 = vector.load %arg3[%c0_29, %c0_30] : memref<32x16xf32, #tpu.memory_space<vmem>>, vector<32x16xf32>
      %57 = arith.mulf %56, %56 : vector<32x16xf32>
      %cst_31 = arith.constant dense<0.000000e+00> : vector<16xf32>
      %58 = vector.multi_reduction <add>, %57, %cst_31 [0] : vector<32x16xf32> to vector<16xf32>
      %59 = vector.shape_cast %58 : vector<16xf32> to vector<1x16xf32>
      %cst_32 = arith.constant 9.99999996E-13 : f32
      %60 = vector.broadcast %cst_32 : f32 to vector<1x16xf32>
      %61 = arith.addf %59, %60 : vector<1x16xf32>
      %62 = math.rsqrt %61 : vector<1x16xf32>
      %63 = vector.broadcast %62 : vector<1x16xf32> to vector<32x16xf32>
      %64 = arith.mulf %56, %63 : vector<32x16xf32>
      %c0_33 = arith.constant 0 : index
      %c0_34 = arith.constant 0 : index
      %65 = vector.load %arg5[%c0_33, %c0_34] : memref<32x16xf32, #tpu.memory_space<vmem>>, vector<32x16xf32>
      tpu.vector_store %arg5[%c0_33, %c0_34], %64 {strides = array<i32>} : memref<32x16xf32, #tpu.memory_space<vmem>>, vector<32x16xf32>,
      %cst_35 = arith.constant 0.000000e+00 : f32
      %66 = vector.broadcast %cst_35 : f32 to vector<1x16xf32>
      %c0_36 = arith.constant 0 : index
      %c0_37 = arith.constant 0 : index
      %67 = vector.load %arg6[%c0_36, %c0_37] : memref<1x16xf32, #tpu.memory_space<vmem>>, vector<1x16xf32>
      tpu.vector_store %arg6[%c0_36, %c0_37], %66 {strides = array<i32>} : memref<1x16xf32, #tpu.memory_space<vmem>>, vector<1x16xf32>,
      %cst_38 = arith.constant 0.000000e+00 : f32
      %68 = vector.broadcast %cst_38 : f32 to vector<1x16xf32>
      %c0_39 = arith.constant 0 : index
      %c0_40 = arith.constant 0 : index
      %69 = vector.load %arg7[%c0_39, %c0_40] : memref<1x16xf32, #tpu.memory_space<vmem>>, vector<1x16xf32>
      tpu.vector_store %arg7[%c0_39, %c0_40], %68 {strides = array<i32>} : memref<1x16xf32, #tpu.memory_space<vmem>>, vector<1x16xf32>,
      %cst_41 = arith.constant 0.000000e+00 : f32
      %70 = vector.broadcast %cst_41 : f32 to vector<1x16xf32>
      %c0_42 = arith.constant 0 : index
      %c0_43 = arith.constant 0 : index
      %71 = vector.load %arg8[%c0_42, %c0_43] : memref<1x16xf32, #tpu.memory_space<vmem>>, vector<1x16xf32>
      tpu.vector_store %arg8[%c0_42, %c0_43], %70 {strides = array<i32>} : memref<1x16xf32, #tpu.memory_space<vmem>>, vector<1x16xf32>,
    } else {
    }
    %c0 = arith.constant 0 : index
    %c0_1 = arith.constant 0 : index
    %3 = vector.load %arg1[%c0, %c0_1] : memref<8x32xf32, #tpu.memory_space<vmem>>, vector<8x32xf32>
    %4 = arith.mulf %3, %3 : vector<8x32xf32>
    %cst = arith.constant dense<0.000000e+00> : vector<8xf32>
    %5 = vector.multi_reduction <add>, %4, %cst [1] : vector<8x32xf32> to vector<8xf32>
    %6 = vector.shape_cast %5 : vector<8xf32> to vector<8x1xf32>
    %cst_2 = arith.constant 9.99999996E-13 : f32
    %7 = vector.broadcast %cst_2 : f32 to vector<8x1xf32>
    %8 = arith.addf %6, %7 : vector<8x1xf32>
    %9 = math.rsqrt %8 : vector<8x1xf32>
    %10 = vector.broadcast %9 : vector<8x1xf32> to vector<8x32xf32>
    %11 = arith.mulf %3, %10 : vector<8x32xf32>
    %c0_3 = arith.constant 0 : index
    %c0_4 = arith.constant 0 : index
    %12 = vector.load %arg5[%c0_3, %c0_4] : memref<32x16xf32, #tpu.memory_space<vmem>>, vector<32x16xf32>
    %cst_5 = arith.constant dense<0.000000e+00> : vector<8x16xf32>
    %13 = tpu.matmul %11, %12, %cst_5 {dimension_numbers = #tpu.dot_dimension_numbers<[1], [0], [0], [1], [0, 0, 1, 1], [], []>} : vector<8x32xf32>, vector<32x16xf32>, vector<8x16xf32> -> vector<8x16xf32>
    %c0_6 = arith.constant 0 : index
    %c0_7 = arith.constant 0 : index
    %14 = vector.load %arg2[%c0_6, %c0_7] : memref<8x1xi32, #tpu.memory_space<vmem>>, vector<8x1xi32>
    %15 = tpu.iota {dimensions = array<i32: 1>} : vector<8x16xi32>
    %16 = vector.broadcast %14 : vector<8x1xi32> to vector<8x16xi32>
    %17 = arith.cmpi eq, %15, %16 : vector<8x16xi32>
    %18 = arith.extui %17 : vector<8x16xi1> to vector<8x16xi32>
    %19 = arith.sitofp %18 : vector<8x16xi32> to vector<8x16xf32>
    %c0_i32_8 = arith.constant 0 : i32
    %20 = vector.broadcast %c0_i32_8 : i32 to vector<8x1xi32>
    %21 = arith.cmpi sge, %14, %20 : vector<8x1xi32>
    %22 = arith.extui %21 : vector<8x1xi1> to vector<8x1xi32>
    %23 = arith.sitofp %22 : vector<8x1xi32> to vector<8x1xf32>
    %24 = vector.broadcast %23 : vector<8x1xf32> to vector<8x16xf32>
    %25 = arith.subf %24, %19 : vector<8x16xf32>
    %c0_9 = arith.constant 0 : index
    %c0_10 = arith.constant 0 : index
    %26 = vector.load %arg6[%c0_9, %c0_10] : memref<1x16xf32, #tpu.memory_space<vmem>>, vector<1x16xf32>
    %cst_11 = arith.constant 1.000000e-01 : f32
    %27 = vector.broadcast %cst_11 : f32 to vector<8x16xf32>
    %28 = arith.subf %13, %27 : vector<8x16xf32>
    %cst_12 = arith.constant -3.200000e+01 : f32
    %29 = vector.broadcast %cst_12 : f32 to vector<8x16xf32>
    %30 = arith.mulf %29, %28 : vector<8x16xf32>
    %31 = math.exp %30 : vector<8x16xf32>
    %32 = arith.mulf %19, %31 : vector<8x16xf32>
    %cst_13 = arith.constant dense<0.000000e+00> : vector<16xf32>
    %33 = vector.multi_reduction <add>, %32, %cst_13 [0] : vector<8x16xf32> to vector<16xf32>
    %34 = vector.shape_cast %33 : vector<16xf32> to vector<1x16xf32>
    %35 = arith.addf %26, %34 : vector<1x16xf32>
    %c0_14 = arith.constant 0 : index
    %c0_15 = arith.constant 0 : index
    %36 = vector.load %arg6[%c0_14, %c0_15] : memref<1x16xf32, #tpu.memory_space<vmem>>, vector<1x16xf32>
    tpu.vector_store %arg6[%c0_14, %c0_15], %35 {strides = array<i32>} : memref<1x16xf32, #tpu.memory_space<vmem>>, vector<1x16xf32>,
    %c0_16 = arith.constant 0 : index
    %c0_17 = arith.constant 0 : index
    %37 = vector.load %arg7[%c0_16, %c0_17] : memref<1x16xf32, #tpu.memory_space<vmem>>, vector<1x16xf32>
    %cst_18 = arith.constant 1.000000e-01 : f32
    %38 = vector.broadcast %cst_18 : f32 to vector<8x16xf32>
    %39 = arith.addf %13, %38 : vector<8x16xf32>
    %cst_19 = arith.constant 3.200000e+01 : f32
    %40 = vector.broadcast %cst_19 : f32 to vector<8x16xf32>
    %41 = arith.mulf %40, %39 : vector<8x16xf32>
    %42 = math.exp %41 : vector<8x16xf32>
    %43 = arith.mulf %25, %42 : vector<8x16xf32>
    %cst_20 = arith.constant dense<0.000000e+00> : vector<16xf32>
    %44 = vector.multi_reduction <add>, %43, %cst_20 [0] : vector<8x16xf32> to vector<16xf32>
    %45 = vector.shape_cast %44 : vector<16xf32> to vector<1x16xf32>
    %46 = arith.addf %37, %45 : vector<1x16xf32>
    %c0_21 = arith.constant 0 : index
    %c0_22 = arith.constant 0 : index
    %47 = vector.load %arg7[%c0_21, %c0_22] : memref<1x16xf32, #tpu.memory_space<vmem>>, vector<1x16xf32>
    tpu.vector_store %arg7[%c0_21, %c0_22], %46 {strides = array<i32>} : memref<1x16xf32, #tpu.memory_space<vmem>>, vector<1x16xf32>,
    %c0_23 = arith.constant 0 : index
    %c0_24 = arith.constant 0 : index
    %48 = vector.load %arg8[%c0_23, %c0_24] : memref<1x16xf32, #tpu.memory_space<vmem>>, vector<1x16xf32>
    %cst_25 = arith.constant dense<0.000000e+00> : vector<16xf32>
    %49 = vector.multi_reduction <add>, %19, %cst_25 [0] : vector<8x16xf32> to vector<16xf32>
    %50 = vector.shape_cast %49 : vector<16xf32> to vector<1x16xf32>
    %51 = arith.addf %48, %50 : vector<1x16xf32>
    %c0_26 = arith.constant 0 : index
    %c0_27 = arith.constant 0 : index
    %52 = vector.load %arg8[%c0_26, %c0_27] : memref<1x16xf32, #tpu.memory_space<vmem>>, vector<1x16xf32>
    tpu.vector_store %arg8[%c0_26, %c0_27], %51 {strides = array<i32>} : memref<1x16xf32, #tpu.memory_space<vmem>>, vector<1x16xf32>,
    %c1_i32 = arith.constant 1 : i32
    %53 = arith.cmpi eq, %arg0, %c1_i32 : i32
    %54 = arith.extui %53 : i1 to i32
    %c0_i32_28 = arith.constant 0 : i32
    %55 = arith.cmpi ne, %54, %c0_i32_28 : i32
    scf.if %55 {
      %c0_29 = arith.constant 0 : index
      %c0_30 = arith.constant 0 : index
      %56 = vector.load %arg8[%c0_29, %c0_30] : memref<1x16xf32, #tpu.memory_space<vmem>>, vector<1x16xf32>
      %cst_31 = arith.constant 0.000000e+00 : f32
      %57 = vector.broadcast %cst_31 : f32 to vector<1x16xf32>
      %58 = arith.cmpf ogt, %56, %57 : vector<1x16xf32>
      %59 = arith.extui %58 : vector<1x16xi1> to vector<1x16xi32>
      %60 = arith.sitofp %59 : vector<1x16xi32> to vector<1x16xf32>
      %61 = vector.shape_cast %60 : vector<1x16xf32> to vector<1x1x16xf32>
      %cst_32 = arith.constant dense<0.000000e+00> : vector<1xf32>
      %62 = vector.multi_reduction <add>, %61, %cst_32 [1, 2] : vector<1x1x16xf32> to vector<1xf32>
      %63 = vector.shape_cast %62 : vector<1xf32> to vector<1x1x1xf32>
      %64 = vector.extract %63[0, 0, 0] : f32 from vector<1x1x1xf32>
      %c0_33 = arith.constant 0 : index
      %c0_34 = arith.constant 0 : index
      %65 = vector.load %arg6[%c0_33, %c0_34] : memref<1x16xf32, #tpu.memory_space<vmem>>, vector<1x16xf32>
      %66 = math.log1p %65 : vector<1x16xf32>
      %67 = vector.shape_cast %66 : vector<1x16xf32> to vector<1x1x16xf32>
      %cst_35 = arith.constant dense<0.000000e+00> : vector<1xf32>
      %68 = vector.multi_reduction <add>, %67, %cst_35 [1, 2] : vector<1x1x16xf32> to vector<1xf32>
      %69 = vector.shape_cast %68 : vector<1xf32> to vector<1x1x1xf32>
      %70 = vector.extract %69[0, 0, 0] : f32 from vector<1x1x1xf32>
      %71 = arith.divf %70, %64 : f32
      %c0_36 = arith.constant 0 : index
      %c0_37 = arith.constant 0 : index
      %72 = vector.load %arg7[%c0_36, %c0_37] : memref<1x16xf32, #tpu.memory_space<vmem>>, vector<1x16xf32>
      %73 = math.log1p %72 : vector<1x16xf32>
      %74 = vector.shape_cast %73 : vector<1x16xf32> to vector<1x1x16xf32>
      %cst_38 = arith.constant dense<0.000000e+00> : vector<1xf32>
      %75 = vector.multi_reduction <add>, %74, %cst_38 [1, 2] : vector<1x1x16xf32> to vector<1xf32>
      %76 = vector.shape_cast %75 : vector<1xf32> to vector<1x1x1xf32>
      %77 = vector.extract %76[0, 0, 0] : f32 from vector<1x1x1xf32>
      %cst_39 = arith.constant 1.600000e+01 : f32
      %78 = arith.divf %77, %cst_39 : f32
      %79 = arith.addf %71, %78 : f32
      %c0_40 = arith.constant 0 : index
      %c0_41 = arith.constant 0 : index
      %80 = memref.load %arg4[%c0_40, %c0_41] : memref<1x1xf32, #tpu.memory_space<smem>>
      memref.store %79, %arg4[%c0_40, %c0_41] : memref<1x1xf32, #tpu.memory_space<smem>>
    } else {
    }
    return
  }
  func.func @transform_0(%arg0: i32) -> (i32, i32) {
    %c0_i32 = arith.constant 0 : i32
    %c0_i32_0 = arith.constant 0 : i32
    return %arg0, %c0_i32 : i32, i32
  }
  func.func @transform_1(%arg0: i32) -> (i32, i32) {
    %c0_i32 = arith.constant 0 : i32
    %c0_i32_0 = arith.constant 0 : i32
    return %arg0, %c0_i32 : i32, i32
  }
  func.func @transform_2(%arg0: i32) -> (i32, i32) {
    %c0_i32 = arith.constant 0 : i32
    %c0_i32_0 = arith.constant 0 : i32
    %c0_i32_1 = arith.constant 0 : i32
    return %c0_i32, %c0_i32_0 : i32, i32
  }
  func.func @transform_3(%arg0: i32) -> (i32, i32) {
    %c0_i32 = arith.constant 0 : i32
    %c0_i32_0 = arith.constant 0 : i32
    %c0_i32_1 = arith.constant 0 : i32
    return %c0_i32, %c0_i32_0 : i32, i32
  }
}

</mosaic_0001>

<bundles_post_ra>
// kernel: tpu_custom_call.1
= control target key start
LH: loop header
LB: loop body
LE: loop exit
PB: predicated region body
PF: predicated region fallthrough
CT: control target
= control target key end

     0   :  { %8 = vsyncpa [#allocation7], 0  ;;  %s617_s12 = smov 0   ;;  %s690_s0 = inlined_call_operand.vmem [shape: f32[16,32], index: 0, kind: input, shape index: {}]   ;;  %s691_s1 = inlined_call_operand.vmem [shape: s32[16,1], index: 1, kind: input, shape index: {}]   ;;  %s692_s2 = inlined_call_operand.vmem [shape: f32[32,16], index: 2, kind: input, shape index: {}]   ;;  %s693_s3 = inlined_call_operand.hbm [shape: f32[1,1], index: 3, kind: output, shape index: {}]  }
   0x1 LB: > { %s623_s13 = sadd.s32 4294967295, %s588_s12   ;;  %p485_p0 = scmp.ge.s32.totalorder %s588_s12, 1  ;;  %s588_s12 = sphi %s617_s12, %s14_s12  }
   0x2   : > { %p141_p1 = scmp.lt.s32.totalorder %s588_s12, 3 }
   0x4   : > { %p142_p2 = pnand %p485_p0, %p141_p1 }
   0x5   : > { %p163_p3 = scmp.lt.s32.totalorder (!%p142_p2), %s623_s13, 1  ;;  %p488_p4 = scmp.ne.s32.totalorder (!%p142_p2), %s623_s13, 0 }
   0x6   : > { %145 = sbr.rel (%p142_p2) target bundleno = 713 (0x2c9), region = 32 }
   0xd   : > { %s164_s14 = scalar_select %p163_p3, %s623_s13, 1 }
   0xe   : > { %174 = sbr.rel (%p488_p4) target bundleno = 53 (0x35), region = 36  ;;  %v175_v0 = vld [vmem:[%s692_s2] sm:$0xff] (!%p488_p4)  ;;  %v176_v1 = vld [vmem:[%s692_s2 + $0x8] sm:$0xff] (!%p488_p4)  ;;  %v177_v2 = vld [vmem:[%s692_s2 + $0x10] sm:$0xff] (!%p488_p4)  ;;  %vm183_vm0 = vcmask (!%p488_p4), 130048   ;;  %vm207_vm1 = vcmask (!%p488_p4), 122880  }
   0xf   : > { %s486_s15 = sshll.u32 %s164_s14, 3  ;;  %v178_v3 = vld [vmem:[%s692_s2 + $0x18] sm:$0xff] (!%p488_p4)  ;;  %v179_v4 = vmul.f32 (!%p488_p4), %v175_v0, %v175_v0  ;;  %v180_v5 = vmul.f32 (!%p488_p4), %v176_v1, %v176_v1  ;;  %v181_v6 = vmul.f32 (!%p488_p4), %v177_v2, %v177_v2  ;;  %v590_v7 = vmov (!%p488_p4), 0.0  }
  0x10   : > { %s632_s18 = scalar_lea.vmem %s690_s0, %s486_s15  ;;  %s637_s21 = scalar_lea.vmem %s691_s1, %s486_s15  ;;  %208 = vst.msk [vmem:[#allocation3] sm:$0x1] (!%p488_p4), %vm207_vm1, %v590_v7  ;;  %209 = vst.msk [vmem:[#allocation4] sm:$0x1] (!%p488_p4), %vm207_vm1, %v590_v7  ;;  %v182_v8 = vmul.f32 (!%p488_p4), %v178_v3, %v178_v3 }
  0x11   : > { %210 = vst.msk [vmem:[#allocation5] sm:$0x1] (!%p488_p4), %vm207_vm1, %v590_v7  ;;  %v184_v9 = vsel (!%p488_p4), %vm183_vm0, %v179_v4, 0.0  ;;  %v185_v10 = vsel (!%p488_p4), %vm183_vm0, %v180_v5, 0.0  ;;  %v187_v11 = vsel (!%p488_p4), %vm183_vm0, %v181_v6, 0.0 }
  0x12   : > { %v186_v12 = vadd.f32 (!%p488_p4), %v185_v10, %v184_v9  ;;  %v189_v13 = vsel (!%p488_p4), %vm183_vm0, %v182_v8, 0.0 }
  0x14   : > { %v188_v14 = vadd.f32 (!%p488_p4), %v187_v11, %v186_v12 }
  0x16   : > { %v190_v15 = vadd.f32 %v189_v13, %v188_v14 }
  0x18   : > { %v191_v16 = vrot.slane %v190_v15, 4 }
  0x1a   : > { %v192_v17 = vadd.f32 %v191_v16, %v190_v15 }
  0x1c   : > { %v193_v18 = vrot.slane %v192_v17, 2 }
  0x1e   : > { %v194_v19 = vadd.f32 %v193_v18, %v192_v17 }
  0x20   : > { %v195_v20 = vrot.slane %v194_v19, 1 }
  0x22   : > { %v196_v21 = vadd.f32 %v195_v20, %v194_v19 }
  0x24   : > { %v197_v22 = vadd.f32 1e-12, %v196_v21 }
  0x26   : > { %550 = vrsqrt.f32 %v197_v22 }
  0x30   : > { %v551_v23 = vpop.eup %550 }
  0x31   : > { %v199_v24 = vmul.f32 %v551_v23, %v175_v0  ;;  %v200_v25 = vmul.f32 %v551_v23, %v176_v1  ;;  %v201_v26 = vmul.f32 %v551_v23, %v177_v2  ;;  %v202_v27 = vmul.f32 %v551_v23, %v178_v3 }
  0x33   : > { %203 = vst.msk [vmem:[#allocation2] sm:$0xff] %vm183_vm0, %v199_v24  ;;  %204 = vst.msk [vmem:[#allocation2 + $0x8] sm:$0xff] %vm183_vm0, %v200_v25 }
  0x34   : > { %205 = vst.msk [vmem:[#allocation2 + $0x10] sm:$0xff] %vm183_vm0, %v201_v26  ;;  %206 = vst.msk [vmem:[#allocation2 + $0x18] sm:$0xff] %vm183_vm0, %v202_v27 }
  0x35 PF: > { %v211_v28 = vld [vmem:[%s632_s18] sm:$0xff]  ;;  %vm213_vm2 = vcmask 261120   ;;  %v591_v34 = vmov 0.0|0.0   ;;  %vm592_vm3 = vmmov 0   ;;  %v593_v37 = vmov 0.0   ;;  %p493_p5 = scmp.ne.s32.totalorder %s623_s13, 1 }
  0x36   : > { %v212_v29 = vmul.f32 %v211_v28, %v211_v28  ;;  %515 = vmatprep.subr.bf16.mxu0 %v591_v34  ;;  %512 = vmatprep.mubr.msk.f32.mxu0 %vm592_vm3, %v593_v37  ;;  %v297_v39 = vld [vmem:[%s637_s21] sm:$0xff]  ;;  %v594_v40 = vmov 0   ;;  %v298_v46 = vlaneseq  ;;  %vm321_vm5 = vcmask 130048  }
  0x37   : > { %552 = vset.pattern.permute.xlu0 %v594_v40  ;;  %553 = vset.pattern.permute.xlu1 %v594_v40  ;;  %vm306_vm4 = vcmp.ge.s32.totalorder %v297_v39, 0  ;;  %vm330_vm7 = vcmask 122880   ;;  %v315_v20 = vld [vmem:[#allocation3] sm:$0x1]  ;;  %v332_v23 = vld [vmem:[#allocation4] sm:$0x1] }
  0x38   : > { %v214_v30 = vsel %vm213_vm2, %v212_v29, 0.0  ;;  %v491_v41 = vsel %vm306_vm4, 1.0, %v593_v37  ;;  %v299_v47 = vand.u32 127, %v298_v46  ;;  %v347_v56 = vld [vmem:[#allocation5] sm:$0x1] }
  0x39   : > { %215 = vadd.xlane.f32.xlu0 %v214_v30  ;;  %311 = vperm.xlu1 %553, %v491_v41   ;;  %v595_v30 = vmov (!%p493_p5), 0.0  }
  0x3a   : > { %v220_v31 = vld [vmem:[#allocation2] sm:$0xff]  ;;  %v221_v32 = vld [vmem:[#allocation2 + $0x8] sm:$0xff] }
  0x3b   : > { %v222_v33 = vld [vmem:[#allocation2 + $0x10] sm:$0xff]  ;;  %v516_v35 = vpack.c.bf16 %v221_v32, %v220_v31  ;;  %v223_v36 = vld [vmem:[#allocation2 + $0x18] sm:$0xff] }
  0x3c   : > { %v519_v38 = vpack.c.bf16 %v223_v36, %v222_v33 }
  0x3d   : > { %517 = vmatpush3.bf16.msra.mxu0 %v516_v35 }
  0x3e   : > { %518 = vmatprep.subr.bf16.mxu0 %v591_v34 }
  0x41   : > { %520 = vmatpush3.bf16.msra.mxu0 %v519_v38 }
  0x4f   : > { %301 = vperm.xlu0 %552, %v297_v39  }
  0xb8   : > { %v312_v3 = vpop.permute.xlu1 %311 }
  0xc6   : > { %v216_v42 = vpop.xlane.xlu0 %215 }
  0xc7   : > { %v217_v43 = vadd.f32 1e-12, %v216_v42 }
  0xc9   : > { %554 = vrsqrt.f32 %v217_v43 }
  0xce   : > { %v302_v48 = vpop.permute.xlu0 %301 }
  0xcf   : > { %vm303_vm6 = vcmp.eq.s32.totalorder %v299_v47, %v302_v48 }
  0xd0   : > { %v490_v49 = vsel %vm303_vm6, 1.0, %v593_v37 }
  0xd1   : > { %v348_v50 = vsel %vm321_vm5, %v490_v49, 0.0  ;;  %v314_v4 = vsub.f32 %v312_v3, %v490_v49 }
  0xd2   : > { %v349_v51 = vrot.slane %v348_v50, 4 }
  0xd3   : > { %v555_v44 = vpop.eup %554 }
  0xd4   : > { %v219_v45 = vmul.f32 %v555_v44, %v211_v28  ;;  %v350_v52 = vadd.f32 %v349_v51, %v348_v50 }
  0xd6   : > { %513 = vmatmul.mubr.msk.f32.vlgmr.msra.gmra.mrb[0].mxu0 %vm213_vm2, %v219_v45  ;;  %v351_v53 = vrot.slane %v350_v52, 2 }
  0xd8   : > { %v352_v54 = vadd.f32 %v351_v53, %v350_v52 }
  0xda   : > { %v353_v55 = vrot.slane %v352_v54, 1 }
  0xdc   : > { %v354_v57 = vadd.f32 %v353_v55, %v352_v54 }
  0xde   : > { %v355_v58 = vadd.f32 %v354_v57, %v347_v56 }
  0xe0   : > { %356 = vst.msk [vmem:[#allocation5] sm:$0x1] %vm330_vm7, %v355_v58 }
  0xe7   : > { %v361_v27 = vld [vmem:[#allocation5] sm:$0x1] (!%p493_p5) }
  0xe8   : > { %vm362_vm8 = vcmp.gt.f32.partialorder (!%p493_p5), %v361_v27, 0.0 }
  0xe9   : > { %v494_v31 = vsel (!%p493_p5), %vm362_vm8, 1.0, %v595_v30 }
  0xea   : > { %v365_v33 = vsel (!%p493_p5), %vm330_vm7, %v494_v31, 0.0 }
  0xeb   : > { %366 = vadd.xlane.f32.xlu0 (!%p493_p5), %v365_v33 }
 0x178   : > { %v367_v51 = vpop.xlane.xlu0 (!%p493_p5), %366 }
 0x179   : > { %v368_v52 = vrot.slane (!%p493_p5), %v367_v51, 4 }
 0x17b   : > { %v369_v53 = vadd.f32 (!%p493_p5), %v368_v52, %v367_v51 }
 0x17d   : > { %v370_v54 = vrot.slane (!%p493_p5), %v369_v53, 2 }
 0x17f   : > { %v371_v55 = vadd.f32 (!%p493_p5), %v370_v54, %v369_v53 }
 0x181   : > { %v372_v56 = vrot.slane (!%p493_p5), %v371_v55, 1 }
 0x183   : > { %v373_v57 = vadd.f32 (!%p493_p5), %v372_v56, %v371_v55 }
 0x185   : > { %521 = vpush (!%p493_p5), %v373_v57 }
 0x1a9   : > { %v293_v59 = vpop.f32.mrb[0].mxu0 }
 0x1aa   : > { %v492_v60 = vadd.f32 -0.1, %v293_v59  ;;  %v333_v61 = vadd.f32 0.1, %v293_v59  ;;  %v514_v62 = vpop.f32.mrb[1].mxu0 }
 0x1ac   : > { %v317_v63 = vmul.f32 -32.0, %v492_v60  ;;  %v334_v0 = vmul.f32 32.0, %v333_v61 }
 0x1ae   : > { %v318_v1 = vmul.f32 1.442695, %v317_v63  ;;  %v335_v2 = vmul.f32 1.442695, %v334_v0 }
 0x1b0   : > { %556 = vpow2.f32 %v318_v1 }
 0x1b1   : > { %558 = vpow2.f32 %v335_v2 }
 0x1b6   : > { %s522_s30 = spop (!%p493_p5), %521 }
 0x1ba   : > { %v557_v5 = vpop.eup %556 }
 0x1bb   : > { %v559_v6 = vpop.eup %558  ;;  %v320_v7 = vmul.f32 %v557_v5, %v490_v49  ;;  %v395_v5 = vstv (!%p493_p5), %s522_s30 }
 0x1bc   : > { %v337_v8 = vmul.f32 %v559_v6, %v314_v4 }
 0x1bd   : > { %v322_v9 = vsel %vm321_vm5, %v320_v7, 0.0 }
 0x1be   : > { %v323_v10 = vrot.slane %v322_v9, 4  ;;  %v338_v11 = vsel %vm321_vm5, %v337_v8, 0.0 }
 0x1bf   : > { %v339_v12 = vrot.slane %v338_v11, 4 }
 0x1c0   : > { %v324_v13 = vadd.f32 %v323_v10, %v322_v9 }
 0x1c1   : > { %v340_v14 = vadd.f32 %v339_v12, %v338_v11 }
 0x1c2   : > { %v325_v15 = vrot.slane %v324_v13, 2 }
 0x1c3   : > { %v341_v16 = vrot.slane %v340_v14, 2 }
 0x1c4   : > { %v326_v17 = vadd.f32 %v325_v15, %v324_v13 }
 0x1c5   : > { %v342_v18 = vadd.f32 %v341_v16, %v340_v14 }
 0x1c6   : > { %v327_v19 = vrot.slane %v326_v17, 1 }
 0x1c7   : > { %v343_v21 = vrot.slane %v342_v18, 1  ;;  %360 = sbr.rel (%p493_p5) target bundleno = 698 (0x2ba), region = 40 }
 0x1c8   : > { %v328_v22 = vadd.f32 %v327_v19, %v326_v17 }
 0x1c9   : > { %v344_v24 = vadd.f32 %v343_v21, %v342_v18 }
 0x1ca   : > { %v329_v25 = vadd.f32 %v328_v22, %v315_v20 }
 0x1cb   : > { %v345_v26 = vadd.f32 %v344_v24, %v332_v23 }
 0x1cc   : > { %331 = vst.msk [vmem:[#allocation3] sm:$0x1] %vm330_vm7, %v329_v25 }
 0x1cd   : > { %346 = vst.msk [vmem:[#allocation4] sm:$0x1] %vm330_vm7, %v345_v26 }
 0x1d3   : > { %v375_v32 = vld [vmem:[#allocation3] sm:$0x1] }
 0x1d4   : > { %v399_v28 = vld [vmem:[#allocation4] sm:$0x1]  ;;  %v376_v35 = vadd.f32 1.0, %v375_v32  ;;  %v379_v36 = vmul.f32 -0.5, %v375_v32  ;;  %v382_v41 = vand.u32 2147483647, %v375_v32 }
 0x1d5   : > { %v400_v29 = vadd.f32 1.0, %v399_v28  ;;  %v403_v34 = vmul.f32 -0.5, %v399_v28  ;;  %v406_v38 = vand.u32 2147483647, %v399_v28 }
 0x1d6   : > { %v380_v39 = vadd.f32 1.0, %v379_v36  ;;  %vm383_vm10 = vcmp.lt.f32.partialorder %v382_v41, 0.0004427343 }
 0x1d7   : > { %560 = vlog2.f32 %v400_v29  ;;  %v404_v37 = vadd.f32 1.0, %v403_v34  ;;  %vm407_vm9 = vcmp.lt.f32.partialorder %v406_v38, 0.0004427343 }
 0x1d8   : > { %562 = vlog2.f32 %v376_v35  ;;  %v381_v44 = vmul.f32 %v380_v39, %v375_v32 }
 0x1d9   : > { %v405_v40 = vmul.f32 %v404_v37, %v399_v28  ;;  %564 = vrcp.f32 %v395_v5 }
 0x1e1   : > { %v561_v42 = vpop.eup %560 }
 0x1e2   : > { %v402_v43 = vmul.f32 0.6931472, %v561_v42  ;;  %v563_v45 = vpop.eup %562 }
 0x1e3   : > { %v378_v48 = vmul.f32 0.6931472, %v563_v45  ;;  %v565_v8 = vpop.eup %564 }
 0x1e4   : > { %v408_v46 = vsel %vm407_vm9, %v405_v40, %v402_v43 }
 0x1e5   : > { %v409_v47 = vsel %vm330_vm7, %v408_v46, 0.0  ;;  %v384_v49 = vsel %vm383_vm10, %v381_v44, %v378_v48 }
 0x1e6   : > { %410 = vadd.xlane.f32.xlu1 %v409_v47  ;;  %v385_v50 = vsel %vm330_vm7, %v384_v49, 0.0 }
 0x1e7   : > { %386 = vadd.xlane.f32.xlu0 %v385_v50 }
 0x273   : > { %v411_v1 = vpop.xlane.xlu1 %410 }
 0x274   : > { %v387_v58 = vpop.xlane.xlu0 %386  ;;  %v412_v2 = vrot.slane %v411_v1, 4 }
 0x275   : > { %v388_v59 = vrot.slane %v387_v58, 4 }
 0x276   : > { %v413_v3 = vadd.f32 %v412_v2, %v411_v1 }
 0x277   : > { %v389_v60 = vadd.f32 %v388_v59, %v387_v58 }
 0x278   : > { %v414_v4 = vrot.slane %v413_v3, 2 }
 0x279   : > { %v390_v61 = vrot.slane %v389_v60, 2 }
 0x27a   : > { %v415_v6 = vadd.f32 %v414_v4, %v413_v3 }
 0x27b   : > { %v391_v62 = vadd.f32 %v390_v61, %v389_v60 }
 0x27c   : > { %v416_v7 = vrot.slane %v415_v6, 1 }
 0x27d   : > { %v392_v63 = vrot.slane %v391_v62, 1 }
 0x27e   : > { %v417_v9 = vadd.f32 %v416_v7, %v415_v6 }
 0x27f   : > { %v393_v0 = vadd.f32 %v392_v63, %v391_v62 }
 0x281   : > { %523 = vpush %v393_v0 }
 0x282   : > { %525 = vpush %v565_v8 }
 0x283   : > { %527 = vpush %v417_v9 }
 0x2b2   : > { %s524_s4 = spop %523 }
 0x2b3   : > { %s526_s5 = spop %525 }
 0x2b4   : > { %s398_s6 = smul.f32 %s526_s5, %s524_s4  ;;  %s528_s7 = spop %527 }
 0x2b5   : > { %s421_s8 = smul.f32 0.0625, %s528_s7 }
 0x2b7   : > { %s422_s9 = sadd.f32 %s421_s8, %s398_s6 }
 0x2b9   : > { %424 = sst [smem:[#allocation6]] %s422_s9 }
 0x2ba PF: > { %p533_p6 = scmp.eq.s32.totalorder %s623_s13, 1  ;;  %s566_s14 = scalar_lea.hbm %s693_s3, 16 }
 0x2bb   : > { %p567_p7 = scmp.ne.s32.totalorder %s693_s3, %s566_s14  ;;  %p572_p10 = scmp.lt.u32.totalorder %s566_s14, %s693_s3 }
 0x2bd   : > { %p568_p8 = pnand %p567_p7, %p533_p6 }
 0x2bf   : > { %p569_p9 = pneg %p568_p8 }
 0x2c1   : > { %p574_p11 = pnand %p572_p10, %p569_p9 }
 0x2c3   : > { %577 = shalt.err (!%p574_p11)
}
 0x2c4   : > { %s596_s19 = smov [#allocation6]  }
 0x2c5   : > { %530 = dma.smem_to_hbm (%p533_p6), %s596_s19, 16, %s693_s3, [#allocation7]  }
 0x2c6   : > { %583 = dma.done.wait (%p533_p6), [#allocation7], 16  }
 0x2c7   : > { %585 = vsyncadd (%p533_p6), [#allocation7], 4294967280 }
 0x2c8   : > { %438 = sfence }
 0x2c9 PF: > { %s14_s12 = sadd.s32 1, %s588_s12  }
 0x2ca   : > { %p11_p12 = scmp.ge.s32.totalorder %s14_s12, 4  }
 0x2cc   :  { %13 = sbr.rel (!%p11_p12) target bundleno = 1 (0x1), region = 71 }
 0x2d3   :  { %444 = vsyncpa [#allocation7], 1 }
 0x2d4   :  { %446 = vsyncpa [#allocation7 + $0x1], 1 }

</bundles_post_ra>
